<compile_context>
chip_gen: v5e
topology: v5e:2x2
jax: 0.10.0
libtpu: 0.0.40
codegen_flags: <defaults>
</compile_context>

<pallas_src>
import jax
import jax.numpy as jnp
from jax import lax
from jax.experimental import pallas as pl
from jax.experimental.pallas import tpu as pltpu

BN_EPS = 1e-5

_USE_BF16_MXU = True   # perf review #4: bf16 MXU operands, f32 accumulate
_DOT_DTYPE = jnp.bfloat16 if _USE_BF16_MXU else jnp.float32


def _vmem_spec():
    # whole array resident in VMEM (all operands here are tiny)
    return pl.BlockSpec(memory_space=pltpu.MemorySpace.VMEM)


# ---------------- Fused whole-net Pallas kernel ----------------

def _make_net_kernel(metas, c0):
    """refs = (data(x+masks), packed folded weights, packed vectors, out).

    Activations stay lane-dense as a (C, Lp) slab flattened (n, h, w) row-major
    on the ORIGINAL H0 x W0 grid with a constant 128-aligned width Lp.  Node i's
    valid pixels sit at grid spacing G_i = prod(previous strides); its KxK conv
    is one matmul of the host-folded (Cout, K*K*C) weight against an im2col
    stack of K*K circularly lane-shifted views (wrap never touches valid cols).
    """
    def kernel(d_ref, w_ref, v_ref, out_ref):
        D = d_ref[...]                           # (c0 + n_masks, Lp) f32
        W = w_ref[...]                           # packed folded tap weights, f32
        V = v_ref[...]                           # packed gamma / beta / folded-bias cols
        slab = D[0:c0, :]                        # (C0, Lp) activations, lane-dense

        for i, md in enumerate(metas):
            C, Cout, KK, r0 = md["C"], md["Cout"], md["KK"], md["w_row0"]
            gamma = V[0:C, 3 * i:3 * i + 1]                      # (C, 1)
            beta = V[0:C, 3 * i + 1:3 * i + 2]                   # (C, 1)
            wb1 = V[0:Cout, 3 * i + 2:3 * i + 3]                 # (Cout, 1) folded bias

            # --- BatchNorm2d (training-mode batch stats), f32, one pass.
            # Invalid columns (conv margins from earlier layers) are zeroed by a
            # host-precomputed mask row so they never pollute the statistics.
            if md["full"]:
                xm = slab
            else:
                xm = slab * D[md["mask_row"]:md["mask_row"] + 1, :]
            inv_n = 1.0 / md["n_valid"]
            mean = jnp.sum(xm, axis=1, keepdims=True) * inv_n            # (C, 1)
            var = jnp.sum(xm * xm, axis=1, keepdims=True) * inv_n - mean * mean
            scale = gamma * lax.rsqrt(var + BN_EPS)                      # (C, 1)
            shift = beta - mean * scale
            # residual 1x1 and KxK taps are folded into W on the host, so only
            # the (cheap, column-broadcast) BN affine touches the slab here.
            y = slab * scale + shift                                     # (C, Lp) f32

            # --- im2col: stack the K*K lane-shifted views of y along sublanes.
            # Circular wrap only ever lands in invalid (masked / sliced) columns.
            blocks = []
            for d in md["taps"]:
                if d == 0:
                    blocks.append(y)
                else:
                    blocks.append(jnp.concatenate([y[:, d:], y[:, :d]], axis=1))
            patches = jnp.concatenate(blocks, axis=0)                    # (KK*C, Lp)

            # --- single fused MXU matmul per layer (bf16 operands, f32 acc).
            wb = W[r0:r0 + Cout, 0:KK * C]                               # (Cout, KK*C)
            slab = jnp.dot(wb.astype(_DOT_DTYPE), patches.astype(_DOT_DTYPE),
                           preferred_element_type=jnp.float32) + wb1     # (Cout, Lp)

        out_ref[...] = slab                      # full-width, lane-aligned store
    return kernel


# ---------------- Wrapper (single pallas_call for the whole net) ----------------

def convolution_net(x_nchw, all_params):
    """NCHW in -> NCHW out; entire ConvolutionNet in one gridless pallas_call."""
    N, C0, H0, W0 = x_nchw.shape
    M0 = N * H0 * W0
    Lp = ((M0 + 127) // 128) * 128               # constant, 128-aligned lane width

    # ---- host-side algebraic folding + operand packing ----
    metas, wblocks, vtriples, mask_rows = [], [], [], []
    G, A, B, C = 1, H0, W0, C0
    row0, max_wcols, max_rows_v = 0, 0, C0
    for p in all_params:
        K, S = int(p["kernel_size"]), int(p["stride"])
        w = p["w"].astype(jnp.float32)                                   # (Cout, C, K, K)
        Cout = w.shape[0]
        w1p = p["w1"].astype(jnp.float32)[:, :, 0, 0] + jnp.eye(C, dtype=jnp.float32)
        taps, wb_list = [], []
        for kh in range(K):
            for kw in range(K):
                wb_list.append(jnp.dot(w[:, :, kh, kw], w1p))            # (Cout, C)
                taps.append(G * (kh * W0 + kw))                          # "a trous" offsets
        wb_stack = jnp.concatenate(wb_list, axis=1)                      # (Cout, K*K*C)
        wb1 = (jnp.dot(jnp.sum(w, axis=(2, 3)),
                       p["b1"].astype(jnp.float32).reshape(C, 1))
               + p["b"].astype(jnp.float32).reshape(Cout, 1))            # (Cout, 1)

        full = (G == 1 and A == H0 and B == W0)
        mrow = -1
        if not full:                                                     # static BN mask
            hh = jnp.arange(H0).reshape(H0, 1)
            ww = jnp.arange(W0).reshape(1, W0)
            ok = ((hh <= G * (A - 1)) & (ww <= G * (B - 1))
                  & (hh % G == 0) & (ww % G == 0))
            m = jnp.tile(ok.reshape(-1).astype(jnp.float32), N)          # (M0,)
            m = jnp.pad(m, (0, Lp - M0)).reshape(1, Lp)
            mrow = C0 + len(mask_rows)
            mask_rows.append(m)

        metas.append(dict(C=C, Cout=Cout, KK=K * K, taps=tuple(taps),
                          n_valid=float(N * A * B), full=full, mask_row=mrow,
                          w_row0=row0))
        wblocks.append((row0, wb_stack))
        vtriples.append((p["bn_gamma"].astype(jnp.float32).reshape(C, 1),
                         p["bn_beta"].astype(jnp.float32).reshape(C, 1),
                         wb1))
        max_wcols = max(max_wcols, K * K * C)
        max_rows_v = max(max_rows_v, C, Cout)
        row0 += ((Cout + 7) // 8) * 8
        A, B = (A - K) // S + 1, (B - K) // S + 1
        G, C = G * S, Cout
    C_last = C

    # packed operand 1: activation slab + precomputed BN mask rows.
    x_flat = jnp.transpose(x_nchw.astype(jnp.float32), (1, 0, 2, 3)).reshape(C0, M0)
    x_flat = jnp.pad(x_flat, ((0, 0), (0, Lp - M0)))
    data = jnp.concatenate([x_flat] + mask_rows, axis=0) if mask_rows else x_flat

    # packed operand 2: all folded tap-weight blocks, one lane-dense slab.
    w_rows = ((row0 + 7) // 8) * 8
    w_cols = ((max_wcols + 127) // 128) * 128
    wpack = jnp.zeros((w_rows, w_cols), jnp.float32)
    for r0, blk in wblocks:
        wpack = wpack.at[r0:r0 + blk.shape[0], :blk.shape[1]].set(blk)

    # packed operand 3: per-channel column vectors (gamma, beta, folded bias).
    v_rows = ((max_rows_v + 7) // 8) * 8
    vpack = jnp.zeros((v_rows, 3 * len(all_params)), jnp.float32)
    for i, (g, b_, wb1) in enumerate(vtriples):
        vpack = vpack.at[:g.shape[0], 3 * i:3 * i + 1].set(g)
        vpack = vpack.at[:b_.shape[0], 3 * i + 1:3 * i + 2].set(b_)
        vpack = vpack.at[:wb1.shape[0], 3 * i + 2:3 * i + 3].set(wb1)

    # advisory cost estimate for XLA scheduling around the custom call.
    flops = 0
    for md in metas:
        flops += 8 * md["C"] * Lp                                        # BN stats + affine
        flops += 2 * md["Cout"] * md["KK"] * md["C"] * Lp                # fused conv matmul
    cost = pl.CostEstimate(
        flops=int(flops),
        transcendentals=int(sum(md["C"] for md in metas)),
        bytes_accessed=int(4 * (data.size + wpack.size + vpack.size + C_last * Lp)))

    # right-sized VMEM budget (operands + largest im2col slab, generous headroom);
    # keeps well clear of v7x's 64 MiB/TC while never constraining v5e/v6e.
    peak = 4 * (data.size + wpack.size + vpack.size + C_last * Lp)
    peak += 4 * max(md["KK"] * md["C"] for md in metas) * Lp * 3
    vmem_limit = min(64 * 1024 * 1024, max(2 * 1024 * 1024, int(8 * peak)))

    out_slab = pl.pallas_call(
        _make_net_kernel(metas, C0),
        out_shape=jax.ShapeDtypeStruct((C_last, Lp), jnp.float32),
        in_specs=[_vmem_spec(), _vmem_spec(), _vmem_spec()],
        out_specs=_vmem_spec(),
        compiler_params=pltpu.CompilerParams(vmem_limit_bytes=vmem_limit),
        cost_estimate=cost,
    )(data, wpack, vpack)

    # Valid outputs sit at grid spacing G on the original H0 x W0 grid.
    out = out_slab[:, :M0].reshape(C_last, N, H0, W0)
    out = out[:, :, :G * (A - 1) + 1:G, :G * (B - 1) + 1:G]
    return jnp.transpose(out, (1, 0, 2, 3))                              # -> NCHW


# ---------------- Parameters (deterministic, in-script) ----------------

def init_params(key, config):
    params = []
    for i in range(len(config["input_channel"])):
        cin = config["input_channel"][i]
        cout = config["hidden_channel"][i]
        k = config["kernel_size"][i]
        key, k1, k2, k3, k4, k5, k6 = jax.random.split(key, 7)
        params.append({
            "w": 0.1 * jax.random.normal(k1, (cout, cin, k, k), jnp.float32),
            "b": 0.1 * jax.random.normal(k2, (cout,), jnp.float32),
            "w1": 0.1 * jax.random.normal(k3, (cin, cin, 1, 1), jnp.float32),
            "b1": 0.1 * jax.random.normal(k4, (cin,), jnp.float32),
            "bn_gamma": 1.0 + 0.1 * jax.random.normal(k5, (cin,), jnp.float32),
            "bn_beta": 0.1 * jax.random.normal(k6, (cin,), jnp.float32),
            "kernel_size": k,
            "stride": config["stride"][i],
        })
    return params


# ---------------- Pure-JAX reference (NCHW, mirrors PyTorch forward) ----------------

def _ref_node(x, p):
    mean = jnp.mean(x, axis=(0, 2, 3), keepdims=True)
    var = jnp.mean((x - mean) ** 2, axis=(0, 2, 3), keepdims=True)
    g = p["bn_gamma"].reshape(1, -1, 1, 1)
    b = p["bn_beta"].reshape(1, -1, 1, 1)
    y = (x - mean) / jnp.sqrt(var + BN_EPS) * g + b
    c2 = lax.conv_general_dilated(y, p["w1"], (1, 1), "VALID",
                                  dimension_numbers=("NCHW", "OIHW", "NCHW"))
    y = y + c2 + p["b1"].reshape(1, -1, 1, 1)
    c = lax.conv_general_dilated(y, p["w"], (p["stride"], p["stride"]), "VALID",
                                 dimension_numbers=("NCHW", "OIHW", "NCHW"))
    return c + p["b"].reshape(1, -1, 1, 1)


def _ref_net(x, all_params):
    for p in all_params:
        x = _ref_node(x, p)
    return x


if __name__ == "__main__":
    # config implied by ConvolutionNet.__init__ (chained: hidden[i] == input[i+1])
    config = {
        "input_channel": [4, 8],
        "hidden_channel": [8, 16],
        "kernel_size": [3, 3],
        "stride": [1, 2],
    }
    key = jax.random.PRNGKey(0)
    key, xkey = jax.random.split(key)
    x = jax.random.normal(xkey, (2, 4, 16, 16), jnp.float32)             # NCHW
    params = init_params(key, config)

    net = jax.jit(lambda inp: convolution_net(inp, params))
    out = jax.block_until_ready(net(x))

    ref = _ref_net(x, params)
    assert out.shape == ref.shape, (out.shape, ref.shape)
    # 2e-2 tolerance reflects bf16 MXU operands (f32 stats/accum); with
    # _USE_BF16_MXU = False the kernel is pure f32 and verifies at 1e-2.
    tol = 2e-2 if _USE_BF16_MXU else 1e-2
    max_err = float(jnp.max(jnp.abs(out - ref)))
    assert jnp.allclose(out, ref, atol=tol, rtol=tol), f"max abs err {max_err}"
    print("KERNEL_OK")
</pallas_src>

<mosaic_0001>
module attributes {stable_mosaic.version = 11 : i64} {
  func.func @kernel(%arg0: memref<5x512xf32, #tpu.memory_space<vmem>>, %arg1: memref<24x128xf32, #tpu.memory_space<vmem>>, %arg2: memref<16x6xf32, #tpu.memory_space<vmem>>, %arg3: memref<16x512xf32, #tpu.memory_space<vmem>>) attributes {dimension_semantics = [], scalar_prefetch = 0 : i64, scratch_operands = 0 : i64, tpu.core_type = #tpu.core_type<tc>} {
    %c0 = arith.constant 0 : index
    %c0_0 = arith.constant 0 : index
    %0 = vector.load %arg0[%c0, %c0_0] : memref<5x512xf32, #tpu.memory_space<vmem>>, vector<5x512xf32>
    %c0_1 = arith.constant 0 : index
    %c0_2 = arith.constant 0 : index
    %1 = vector.load %arg1[%c0_1, %c0_2] : memref<24x128xf32, #tpu.memory_space<vmem>>, vector<24x128xf32>
    %c0_3 = arith.constant 0 : index
    %c0_4 = arith.constant 0 : index
    %2 = vector.load %arg2[%c0_3, %c0_4] : memref<16x6xf32, #tpu.memory_space<vmem>>, vector<16x6xf32>
    %3 = vector.extract_strided_slice %0 {offsets = [0, 0], sizes = [4, 512], strides = [1, 1]} : vector<5x512xf32> to vector<4x512xf32>
    %4 = vector.extract_strided_slice %2 {offsets = [0, 0], sizes = [4, 1], strides = [1, 1]} : vector<16x6xf32> to vector<4x1xf32>
    %5 = vector.extract_strided_slice %2 {offsets = [0, 1], sizes = [4, 1], strides = [1, 1]} : vector<16x6xf32> to vector<4x1xf32>
    %6 = vector.extract_strided_slice %2 {offsets = [0, 2], sizes = [8, 1], strides = [1, 1]} : vector<16x6xf32> to vector<8x1xf32>
    %cst = arith.constant dense<0.000000e+00> : vector<4xf32>
    %7 = vector.multi_reduction <add>, %3, %cst [1] : vector<4x512xf32> to vector<4xf32>
    %8 = vector.shape_cast %7 : vector<4xf32> to vector<4x1xf32>
    %cst_5 = arith.constant 0.001953125 : f32
    %9 = vector.broadcast %cst_5 : f32 to vector<4x1xf32>
    %10 = arith.mulf %8, %9 : vector<4x1xf32>
    %11 = arith.mulf %3, %3 : vector<4x512xf32>
    %cst_6 = arith.constant dense<0.000000e+00> : vector<4xf32>
    %12 = vector.multi_reduction <add>, %11, %cst_6 [1] : vector<4x512xf32> to vector<4xf32>
    %13 = vector.shape_cast %12 : vector<4xf32> to vector<4x1xf32>
    %cst_7 = arith.constant 0.001953125 : f32
    %14 = vector.broadcast %cst_7 : f32 to vector<4x1xf32>
    %15 = arith.mulf %13, %14 : vector<4x1xf32>
    %16 = arith.mulf %10, %10 : vector<4x1xf32>
    %17 = arith.subf %15, %16 : vector<4x1xf32>
    %cst_8 = arith.constant 9.99999974E-6 : f32
    %18 = vector.broadcast %cst_8 : f32 to vector<4x1xf32>
    %19 = arith.addf %17, %18 : vector<4x1xf32>
    %20 = math.rsqrt %19 : vector<4x1xf32>
    %21 = arith.mulf %4, %20 : vector<4x1xf32>
    %22 = arith.mulf %10, %21 : vector<4x1xf32>
    %23 = arith.subf %5, %22 : vector<4x1xf32>
    %24 = vector.broadcast %21 : vector<4x1xf32> to vector<4x512xf32>
    %25 = arith.mulf %3, %24 : vector<4x512xf32>
    %26 = vector.broadcast %23 : vector<4x1xf32> to vector<4x512xf32>
    %27 = arith.addf %25, %26 : vector<4x512xf32>
    %28 = vector.extract_strided_slice %27 {offsets = [0, 1], sizes = [4, 511], strides = [1, 1]} : vector<4x512xf32> to vector<4x511xf32>
    %29 = vector.extract_strided_slice %27 {offsets = [0, 0], sizes = [4, 1], strides = [1, 1]} : vector<4x512xf32> to vector<4x1xf32>
    %30 = tpu.concatenate %28, %29 in 1 : vector<4x511xf32>, vector<4x1xf32> -> vector<4x512xf32>
    %31 = vector.extract_strided_slice %27 {offsets = [0, 2], sizes = [4, 510], strides = [1, 1]} : vector<4x512xf32> to vector<4x510xf32>
    %32 = vector.extract_strided_slice %27 {offsets = [0, 0], sizes = [4, 2], strides = [1, 1]} : vector<4x512xf32> to vector<4x2xf32>
    %33 = tpu.concatenate %31, %32 in 1 : vector<4x510xf32>, vector<4x2xf32> -> vector<4x512xf32>
    %34 = vector.extract_strided_slice %27 {offsets = [0, 16], sizes = [4, 496], strides = [1, 1]} : vector<4x512xf32> to vector<4x496xf32>
    %35 = vector.extract_strided_slice %27 {offsets = [0, 0], sizes = [4, 16], strides = [1, 1]} : vector<4x512xf32> to vector<4x16xf32>
    %36 = tpu.concatenate %34, %35 in 1 : vector<4x496xf32>, vector<4x16xf32> -> vector<4x512xf32>
    %37 = vector.extract_strided_slice %27 {offsets = [0, 17], sizes = [4, 495], strides = [1, 1]} : vector<4x512xf32> to vector<4x495xf32>
    %38 = vector.extract_strided_slice %27 {offsets = [0, 0], sizes = [4, 17], strides = [1, 1]} : vector<4x512xf32> to vector<4x17xf32>
    %39 = tpu.concatenate %37, %38 in 1 : vector<4x495xf32>, vector<4x17xf32> -> vector<4x512xf32>
    %40 = vector.extract_strided_slice %27 {offsets = [0, 18], sizes = [4, 494], strides = [1, 1]} : vector<4x512xf32> to vector<4x494xf32>
    %41 = vector.extract_strided_slice %27 {offsets = [0, 0], sizes = [4, 18], strides = [1, 1]} : vector<4x512xf32> to vector<4x18xf32>
    %42 = tpu.concatenate %40, %41 in 1 : vector<4x494xf32>, vector<4x18xf32> -> vector<4x512xf32>
    %43 = vector.extract_strided_slice %27 {offsets = [0, 32], sizes = [4, 480], strides = [1, 1]} : vector<4x512xf32> to vector<4x480xf32>
    %44 = vector.extract_strided_slice %27 {offsets = [0, 0], sizes = [4, 32], strides = [1, 1]} : vector<4x512xf32> to vector<4x32xf32>
    %45 = tpu.concatenate %43, %44 in 1 : vector<4x480xf32>, vector<4x32xf32> -> vector<4x512xf32>
    %46 = vector.extract_strided_slice %27 {offsets = [0, 33], sizes = [4, 479], strides = [1, 1]} : vector<4x512xf32> to vector<4x479xf32>
    %47 = vector.extract_strided_slice %27 {offsets = [0, 0], sizes = [4, 33], strides = [1, 1]} : vector<4x512xf32> to vector<4x33xf32>
    %48 = tpu.concatenate %46, %47 in 1 : vector<4x479xf32>, vector<4x33xf32> -> vector<4x512xf32>
    %49 = vector.extract_strided_slice %27 {offsets = [0, 34], sizes = [4, 478], strides = [1, 1]} : vector<4x512xf32> to vector<4x478xf32>
    %50 = vector.extract_strided_slice %27 {offsets = [0, 0], sizes = [4, 34], strides = [1, 1]} : vector<4x512xf32> to vector<4x34xf32>
    %51 = tpu.concatenate %49, %50 in 1 : vector<4x478xf32>, vector<4x34xf32> -> vector<4x512xf32>
    %52 = tpu.concatenate %27, %30, %33, %36, %39, %42, %45, %48, %51 in 0 : vector<4x512xf32>, vector<4x512xf32>, vector<4x512xf32>, vector<4x512xf32>, vector<4x512xf32>, vector<4x512xf32>, vector<4x512xf32>, vector<4x512xf32>, vector<4x512xf32> -> vector<36x512xf32>
    %53 = vector.extract_strided_slice %1 {offsets = [0, 0], sizes = [8, 36], strides = [1, 1]} : vector<24x128xf32> to vector<8x36xf32>
    %54 = arith.truncf %53 : vector<8x36xf32> to vector<8x36xbf16>
    %55 = arith.truncf %52 : vector<36x512xf32> to vector<36x512xbf16>
    %cst_9 = arith.constant dense<0.000000e+00> : vector<8x512xf32>
    %56 = tpu.matmul %54, %55, %cst_9 {dimension_numbers = #tpu.dot_dimension_numbers<[1], [0], [0], [1], [0, 0, 1, 1], [], []>} : vector<8x36xbf16>, vector<36x512xbf16>, vector<8x512xf32> -> vector<8x512xf32>
    %57 = vector.broadcast %6 : vector<8x1xf32> to vector<8x512xf32>
    %58 = arith.addf %56, %57 : vector<8x512xf32>
    %59 = vector.extract_strided_slice %2 {offsets = [0, 3], sizes = [8, 1], strides = [1, 1]} : vector<16x6xf32> to vector<8x1xf32>
    %60 = vector.extract_strided_slice %2 {offsets = [0, 4], sizes = [8, 1], strides = [1, 1]} : vector<16x6xf32> to vector<8x1xf32>
    %61 = vector.extract_strided_slice %2 {offsets = [0, 5], sizes = [16, 1], strides = [1, 1]} : vector<16x6xf32> to vector<16x1xf32>
    %62 = vector.extract_strided_slice %0 {offsets = [4, 0], sizes = [1, 512], strides = [1, 1]} : vector<5x512xf32> to vector<1x512xf32>
    %63 = vector.broadcast %62 : vector<1x512xf32> to vector<8x512xf32>
    %64 = arith.mulf %58, %63 : vector<8x512xf32>
    %cst_10 = arith.constant dense<0.000000e+00> : vector<8xf32>
    %65 = vector.multi_reduction <add>, %64, %cst_10 [1] : vector<8x512xf32> to vector<8xf32>
    %66 = vector.shape_cast %65 : vector<8xf32> to vector<8x1xf32>
    %cst_11 = arith.constant 0.00255102036 : f32
    %67 = vector.broadcast %cst_11 : f32 to vector<8x1xf32>
    %68 = arith.mulf %66, %67 : vector<8x1xf32>
    %69 = arith.mulf %64, %64 : vector<8x512xf32>
    %cst_12 = arith.constant dense<0.000000e+00> : vector<8xf32>
    %70 = vector.multi_reduction <add>, %69, %cst_12 [1] : vector<8x512xf32> to vector<8xf32>
    %71 = vector.shape_cast %70 : vector<8xf32> to vector<8x1xf32>
    %cst_13 = arith.constant 0.00255102036 : f32
    %72 = vector.broadcast %cst_13 : f32 to vector<8x1xf32>
    %73 = arith.mulf %71, %72 : vector<8x1xf32>
    %74 = arith.mulf %68, %68 : vector<8x1xf32>
    %75 = arith.subf %73, %74 : vector<8x1xf32>
    %cst_14 = arith.constant 9.99999974E-6 : f32
    %76 = vector.broadcast %cst_14 : f32 to vector<8x1xf32>
    %77 = arith.addf %75, %76 : vector<8x1xf32>
    %78 = math.rsqrt %77 : vector<8x1xf32>
    %79 = arith.mulf %59, %78 : vector<8x1xf32>
    %80 = arith.mulf %68, %79 : vector<8x1xf32>
    %81 = arith.subf %60, %80 : vector<8x1xf32>
    %82 = vector.broadcast %79 : vector<8x1xf32> to vector<8x512xf32>
    %83 = arith.mulf %58, %82 : vector<8x512xf32>
    %84 = vector.broadcast %81 : vector<8x1xf32> to vector<8x512xf32>
    %85 = arith.addf %83, %84 : vector<8x512xf32>
    %86 = vector.extract_strided_slice %85 {offsets = [0, 1], sizes = [8, 511], strides = [1, 1]} : vector<8x512xf32> to vector<8x511xf32>
    %87 = vector.extract_strided_slice %85 {offsets = [0, 0], sizes = [8, 1], strides = [1, 1]} : vector<8x512xf32> to vector<8x1xf32>
    %88 = tpu.concatenate %86, %87 in 1 : vector<8x511xf32>, vector<8x1xf32> -> vector<8x512xf32>
    %89 = vector.extract_strided_slice %85 {offsets = [0, 2], sizes = [8, 510], strides = [1, 1]} : vector<8x512xf32> to vector<8x510xf32>
    %90 = vector.extract_strided_slice %85 {offsets = [0, 0], sizes = [8, 2], strides = [1, 1]} : vector<8x512xf32> to vector<8x2xf32>
    %91 = tpu.concatenate %89, %90 in 1 : vector<8x510xf32>, vector<8x2xf32> -> vector<8x512xf32>
    %92 = vector.extract_strided_slice %85 {offsets = [0, 16], sizes = [8, 496], strides = [1, 1]} : vector<8x512xf32> to vector<8x496xf32>
    %93 = vector.extract_strided_slice %85 {offsets = [0, 0], sizes = [8, 16], strides = [1, 1]} : vector<8x512xf32> to vector<8x16xf32>
    %94 = tpu.concatenate %92, %93 in 1 : vector<8x496xf32>, vector<8x16xf32> -> vector<8x512xf32>
    %95 = vector.extract_strided_slice %85 {offsets = [0, 17], sizes = [8, 495], strides = [1, 1]} : vector<8x512xf32> to vector<8x495xf32>
    %96 = vector.extract_strided_slice %85 {offsets = [0, 0], sizes = [8, 17], strides = [1, 1]} : vector<8x512xf32> to vector<8x17xf32>
    %97 = tpu.concatenate %95, %96 in 1 : vector<8x495xf32>, vector<8x17xf32> -> vector<8x512xf32>
    %98 = vector.extract_strided_slice %85 {offsets = [0, 18], sizes = [8, 494], strides = [1, 1]} : vector<8x512xf32> to vector<8x494xf32>
    %99 = vector.extract_strided_slice %85 {offsets = [0, 0], sizes = [8, 18], strides = [1, 1]} : vector<8x512xf32> to vector<8x18xf32>
    %100 = tpu.concatenate %98, %99 in 1 : vector<8x494xf32>, vector<8x18xf32> -> vector<8x512xf32>
    %101 = vector.extract_strided_slice %85 {offsets = [0, 32], sizes = [8, 480], strides = [1, 1]} : vector<8x512xf32> to vector<8x480xf32>
    %102 = vector.extract_strided_slice %85 {offsets = [0, 0], sizes = [8, 32], strides = [1, 1]} : vector<8x512xf32> to vector<8x32xf32>
    %103 = tpu.concatenate %101, %102 in 1 : vector<8x480xf32>, vector<8x32xf32> -> vector<8x512xf32>
    %104 = vector.extract_strided_slice %85 {offsets = [0, 33], sizes = [8, 479], strides = [1, 1]} : vector<8x512xf32> to vector<8x479xf32>
    %105 = vector.extract_strided_slice %85 {offsets = [0, 0], sizes = [8, 33], strides = [1, 1]} : vector<8x512xf32> to vector<8x33xf32>
    %106 = tpu.concatenate %104, %105 in 1 : vector<8x479xf32>, vector<8x33xf32> -> vector<8x512xf32>
    %107 = vector.extract_strided_slice %85 {offsets = [0, 34], sizes = [8, 478], strides = [1, 1]} : vector<8x512xf32> to vector<8x478xf32>
    %108 = vector.extract_strided_slice %85 {offsets = [0, 0], sizes = [8, 34], strides = [1, 1]} : vector<8x512xf32> to vector<8x34xf32>
    %109 = tpu.concatenate %107, %108 in 1 : vector<8x478xf32>, vector<8x34xf32> -> vector<8x512xf32>
    %110 = tpu.concatenate %85, %88, %91, %94, %97, %100, %103, %106, %109 in 0 : vector<8x512xf32>, vector<8x512xf32>, vector<8x512xf32>, vector<8x512xf32>, vector<8x512xf32>, vector<8x512xf32>, vector<8x512xf32>, vector<8x512xf32>, vector<8x512xf32> -> vector<72x512xf32>
    %111 = vector.extract_strided_slice %1 {offsets = [8, 0], sizes = [16, 72], strides = [1, 1]} : vector<24x128xf32> to vector<16x72xf32>
    %112 = arith.truncf %111 : vector<16x72xf32> to vector<16x72xbf16>
    %113 = arith.truncf %110 : vector<72x512xf32> to vector<72x512xbf16>
    %cst_15 = arith.constant dense<0.000000e+00> : vector<16x512xf32>
    %114 = tpu.matmul %112, %113, %cst_15 {dimension_numbers = #tpu.dot_dimension_numbers<[1], [0], [0], [1], [0, 0, 1, 1], [], []>} : vector<16x72xbf16>, vector<72x512xbf16>, vector<16x512xf32> -> vector<16x512xf32>
    %115 = vector.broadcast %61 : vector<16x1xf32> to vector<16x512xf32>
    %116 = arith.addf %114, %115 : vector<16x512xf32>
    %c0_16 = arith.constant 0 : index
    %c0_17 = arith.constant 0 : index
    %117 = vector.load %arg3[%c0_16, %c0_17] : memref<16x512xf32, #tpu.memory_space<vmem>>, vector<16x512xf32>
    tpu.vector_store %arg3[%c0_16, %c0_17], %116 {strides = array<i32>} : memref<16x512xf32, #tpu.memory_space<vmem>>, vector<16x512xf32>,
    return
  }
}

</mosaic_0001>

<bundles_post_ra>
// kernel: _lambda_.1
= control target key start
LH: loop header
LB: loop body
LE: loop exit
PB: predicated region body
PF: predicated region fallthrough
CT: control target
= control target key end

     0   :  { %vm24_vm0 = vcmask 1043456   ;;  %v858_v24 = vmov 0   ;;  %s859_s21 = smov 1   ;;  %v860_v40 = vmov 1   ;;  %s861_s22 = smov 95   ;;  %vm213_vm4 = vcmask 769024   ;;  %s1163_s0 = inlined_call_operand.vmem [shape: f32[5,512], index: 0, kind: input, shape index: {}]   ;;  %s1164_s2 = inlined_call_operand.vmem [shape: f32[16,6], index: 2, kind: input, shape index: {}]   ;;  %s1165_s1 = inlined_call_operand.vmem [shape: f32[24,128], index: 1, kind: input, shape index: {}]   ;;  %s1166_s3 = inlined_call_operand.vmem [shape: f32[16,512], index: 3, kind: output, shape index: {}]  }
   0x1   :  { %v896_v0 = vld [vmem:[%s1163_s0] sm:$0x1f]  ;;  %v901_v1 = vld [vmem:[%s1163_s0 + $0x8] sm:$0x1f]  ;;  %v906_v2 = vld [vmem:[%s1163_s0 + $0x10] sm:$0x1f]  ;;  %701 = vset.pattern.permute.xlu1 %v858_v24  ;;  %702 = vset.pattern.permute.xlu2 %v860_v40 }
   0x2   :  { %v911_v3 = vld [vmem:[%s1163_s0 + $0x18] sm:$0x1f]  ;;  %v25_v4 = vsel %vm24_vm0, %v896_v0, 0.0  ;;  %v26_v5 = vsel %vm24_vm0, %v901_v1, 0.0  ;;  %v28_v6 = vsel %vm24_vm0, %v906_v2, 0.0  ;;  %v35_v7 = vmul.f32 %v896_v0, %v896_v0  ;;  %v936_v35 = vld [vmem:[%s1164_s2] sm:$0xff] }
   0x3   :  { %v27_v8 = vadd.f32 %v26_v5, %v25_v4  ;;  %v36_v9 = vmul.f32 %v901_v1, %v901_v1  ;;  %v37_v10 = vmul.f32 %v906_v2, %v906_v2  ;;  %v30_v11 = vsel %vm24_vm0, %v911_v3, 0.0  ;;  %s862_s23 = smov 110   ;;  %s863_s24 = smov 94  }
   0x4   :  { %v39_v12 = vsel %vm24_vm0, %v35_v7, 0.0  ;;  %v38_v15 = vmul.f32 %v911_v3, %v911_v3  ;;  %s864_s25 = smov 111   ;;  %s865_s26 = smov 127   ;;  %vm297_vm5 = vcmask 1041408   ;;  %vm165_vm6 = vcmask 900096  }
   0x5   :  { %v29_v13 = vadd.f32 %v28_v6, %v27_v8  ;;  %v40_v14 = vsel %vm24_vm0, %v36_v9, 0.0  ;;  %v42_v17 = vsel %vm24_vm0, %v37_v10, 0.0  ;;  %s866_s27 = smov 96   ;;  %s867_s28 = smov 112   ;;  %vm198_vm7 = vcmask 777216  }
   0x6   :  { %v41_v16 = vadd.f32 %v40_v14, %v39_v12  ;;  %v44_v20 = vsel %vm24_vm0, %v38_v15, 0.0  ;;  %s868_s29 = smov 126   ;;  %vm99_vm8 = vcmask 1039360   ;;  %vm147_vm9 = vcmask 908288  }
   0x7   :  { %v31_v18 = vadd.f32 %v30_v11, %v29_v13  ;;  %vm180_vm10 = vcmask 785408   ;;  %vm132_vm11 = vcmask 916480   ;;  %vm114_vm12 = vcmask 1031168  }
   0x8   :  { %v43_v19 = vadd.f32 %v42_v17, %v41_v16  ;;  %vm293_vm13 = vcmask 293888  }
   0x9   :  { %32 = vadd.xlane.f32.xlu0 %v31_v18 }
   0xa   :  { %v45_v21 = vadd.f32 %v44_v20, %v43_v19 }
  0x11   :  { %46 = vadd.xlane.f32.xlu0 %v45_v21 }
  0x7c   :  { %v33_v22 = vpop.xlane.xlu0 %32 }
  0x7d   :  { %v34_v23 = vmul.f32 0.001953125, %v33_v22 }
  0x7f   :  { %v49_v26 = vmul.f32 %v34_v23, %v34_v23 }
  0x84   :  { %v47_v25 = vpop.xlane.xlu0 %46 }
  0x85   :  { %v48_v27 = vmul.f32 0.001953125, %v47_v25 }
  0x87   :  { %v50_v28 = vsub.f32 %v48_v27, %v49_v26 }
  0x89   :  { %v51_v29 = vadd.f32 1e-05, %v50_v28 }
  0x8b   :  { %854 = vrsqrt.f32 %v51_v29  ;;  %vm58_vm2 = vweird.f32 %v51_v29 }
  0x91   :  { %v855_v30 = vpop.eup %854 }
  0x92   :  { %v53_v31 = vmul.f32 %v855_v30, %v51_v29  ;;  %vm59_vm1 = vweird.f32 %v855_v30 }
  0x93   :  { %vm60_vm3 = vmor %vm58_vm2, %vm59_vm1 }
  0x94   :  { %v54_v32 = vmul.f32 %v855_v30, %v53_v31 }
  0x96   :  { %v55_v33 = vmul.f32 0.5, %v54_v32 }
  0x98   :  { %v56_v34 = vsub.f32 1.5, %v55_v33 }
  0x9a   :  { %v57_v36 = vmul.f32 %v855_v30, %v56_v34 }
  0x9c   :  { %v61_v37 = vsel %vm60_vm3, %v855_v30, %v57_v36 }
  0x9d   :  { %v62_v38 = vmul.f32 %v61_v37, %v936_v35 }
  0x9f   :  { %v63_v39 = vmul.f32 %v62_v38, %v34_v23 }
  0xa1   :  { %65 = vrot.lane.b32.xlu1 %v63_v39, %s859_s21 }
  0xa9   :  { %71 = vperm.xlu1 %701, %v62_v38  }
 0x113   :  { %v66_v41 = vpop.permute.xlu1 %65 }
 0x114   :  { %v68_v42 = vsub.f32 %v936_v35, %v66_v41 }
 0x116   :  { %80 = vperm.xlu2 %702, %v68_v42  }
 0x11b   :  { %v72_v43 = vpop.permute.xlu1 %71 }
 0x11c   :  { %v76_v44 = vmul.f32 %v72_v43, %v906_v2  ;;  %v77_v45 = vmul.f32 %v72_v43, %v911_v3  ;;  %v74_v50 = vmul.f32 %v72_v43, %v896_v0  ;;  %v75_v51 = vmul.f32 %v72_v43, %v901_v1 }
 0x170   :  { %v81_v46 = vpop.permute.xlu2 %80 }
 0x171   :  { %v943_v47 = vadd.f32 %v81_v46, %v76_v44  ;;  %v945_v48 = vadd.f32 %v81_v46, %v77_v45  ;;  %v954_v52 = vadd.f32 %v81_v46, %v74_v50  ;;  %v956_v53 = vadd.f32 %v81_v46, %v75_v51 }
 0x173   :  { %v713_v49 = vpack.i.bf16 %v945_v48, %v943_v47  ;;  %v718_v54 = vpack.i.bf16 %v956_v53, %v954_v52 }
 0x175   :  { %714 = vrot.lane.b32.xlu1 %v713_v49, %s861_s22  ;;  %709 = vrot.lane.b32.xlu0 %v713_v49, %s862_s23 }
 0x176   :  { %704 = vrot.lane.b32.xlu2 %v713_v49, %s863_s24 }
 0x17d   :  { %724 = vrot.lane.b32.xlu1 %v713_v49, %s864_s25  ;;  %744 = vrot.lane.b32.xlu0 %v713_v49, %s865_s26 }
 0x17e   :  { %719 = vrot.lane.b32.xlu2 %v718_v54, %s863_s24 }
 0x185   :  { %734 = vrot.lane.b32.xlu1 %v713_v49, %s866_s27  ;;  %759 = vrot.lane.b32.xlu0 %v718_v54, %s866_s27 }
 0x186   :  { %729 = vrot.lane.b32.xlu2 %v718_v54, %s862_s23 }
 0x18d   :  { %749 = vrot.lane.b32.xlu1 %v713_v49, %s867_s28  ;;  %774 = vrot.lane.b32.xlu0 %v718_v54, %s867_s28 }
 0x18e   :  { %739 = vrot.lane.b32.xlu2 %v718_v54, %s861_s22 }
 0x195   :  { %764 = vrot.lane.b32.xlu1 %v718_v54, %s865_s26 }
 0x196   :  { %754 = vrot.lane.b32.xlu2 %v718_v54, %s864_s25 }
 0x19d   :  { %779 = vrot.lane.b32.xlu1 %v718_v54, %s868_s29 }
 0x19e   :  { %769 = vrot.lane.b32.xlu2 %v713_v49, %s868_s29 }
 0x1d0   :  { %v705_v55 = vpop.permute.xlu2 %704 }
 0x1d1   :  { %v707_v56 = vunpack.i.h.bf16 %v705_v55  ;;  %v706_v57 = vunpack.i.l.bf16 %v705_v55 }
 0x1d3   :  { %v216_v58 = vsel %vm213_vm4, %v706_v57, %v707_v56 }
 0x1d4   :  { %v286_v59 = vpack.c.bf16 %v216_v58, %v216_v58 }
 0x1d6   :  { %v305_v60 = vsel %vm297_vm5, %v286_v59, 0 }
 0x1d7   :  { %341 = vmatpush.bf16.msra.mxu2 %v305_v60 }
 0x1d8   :  { %v720_v61 = vpop.permute.xlu2 %719 }
 0x1d9   :  { %v722_v62 = vunpack.i.h.bf16 %v720_v61  ;;  %v721_v63 = vunpack.i.l.bf16 %v720_v61 }
 0x1db   :  { %v214_v4 = vsel %vm213_vm4, %v721_v63, %v722_v62  ;;  %v215_v5 = vsel %vm213_vm4, %v722_v62, %v706_v57  ;;  %v222_v6 = vsel %vm213_vm4, %v707_v56, %v721_v63 }
 0x1dc   :  { %v284_v7 = vpack.c.bf16 %v214_v4, %v214_v4  ;;  %v285_v8 = vpack.c.bf16 %v215_v5, %v215_v5  ;;  %v287_v9 = vpack.c.bf16 %v222_v6, %v222_v6 }
 0x1de   :  { %v299_v10 = vsel %vm297_vm5, %v284_v7, 0  ;;  %v302_v11 = vsel %vm297_vm5, %v285_v8, 0  ;;  %v308_v12 = vsel %vm297_vm5, %v287_v9, 0 }
 0x1df   :  { %315 = vmatpush.bf16.msra.mxu0 %v299_v10  ;;  %328 = vmatpush.bf16.msra.mxu1 %v302_v11 }
 0x1e0   :  { %354 = vmatpush.bf16.msra.mxu3 %v308_v12  ;;  %v730_v13 = vpop.permute.xlu2 %729 }
 0x1e1   :  { %v732_v17 = vunpack.i.h.bf16 %v730_v13  ;;  %v731_v18 = vunpack.i.l.bf16 %v730_v13 }
 0x1e3   :  { %v166_v26 = vsel %vm165_vm6, %v731_v18, %v732_v17 }
 0x1e4   :  { %v242_v39 = vrot.slane %v166_v26, 4 }
 0x1e7   :  { %v715_v14 = vpop.permute.xlu1 %714  ;;  %v710_v15 = vpop.permute.xlu0 %709 }
 0x1e8   :  { %v740_v16 = vpop.permute.xlu2 %739  ;;  %v717_v19 = vunpack.i.h.bf16 %v715_v14  ;;  %v716_v20 = vunpack.i.l.bf16 %v715_v14  ;;  %v712_v21 = vunpack.i.h.bf16 %v710_v15  ;;  %v711_v22 = vunpack.i.l.bf16 %v710_v15 }
 0x1e9   :  { %v742_v23 = vunpack.i.h.bf16 %v740_v16  ;;  %v741_v28 = vunpack.i.l.bf16 %v740_v16 }
 0x1ea   :  { %v201_v27 = vsel %vm198_vm7, %v716_v20, %v717_v19  ;;  %v167_v30 = vsel %vm165_vm6, %v732_v17, %v711_v22  ;;  %v168_v31 = vsel %vm165_vm6, %v711_v22, %v712_v21  ;;  %v171_v32 = vsel %vm165_vm6, %v712_v21, %v731_v18 }
 0x1eb   :  { %v200_v33 = vsel %vm198_vm7, %v742_v23, %v716_v20  ;;  %v253_v40 = vrot.slane %v201_v27, 4  ;;  %v199_v41 = vsel %vm198_vm7, %v741_v28, %v742_v23  ;;  %v204_v42 = vsel %vm198_vm7, %v717_v19, %v741_v28 }
 0x1ec   :  { %v243_v43 = vrot.slane %v167_v30, 4  ;;  %v244_v44 = vrot.slane %v168_v31, 4  ;;  %v245_v45 = vrot.slane %v171_v32, 4  ;;  %v252_v46 = vrot.slane %v200_v33, 4  ;;  %v19_v33 = vld [vmem:[%s1165_s1] sm:$0xff] }
 0x1ed   :  { %v251_v55 = vrot.slane %v199_v41, 4  ;;  %v254_v56 = vrot.slane %v204_v42, 4  ;;  %v869_v28 = vmov 2  }
 0x1ee   :  { %783 = vset.pattern.permute.xlu2 %v869_v28 }
 0x1ef   :  { %v725_v24 = vpop.permute.xlu1 %724  ;;  %v977_v25 = vpop.permute.xlu0 %744  ;;  %290 = vperm.xlu2 %783, %v936_v35  }
 0x1f0   :  { %v755_v29 = vpop.permute.xlu2 %754  ;;  %v727_v34 = vunpack.i.h.bf16 %v725_v24  ;;  %v726_v36 = vunpack.i.l.bf16 %v725_v24  ;;  %v747_v57 = vunpack.i.h.bf16 %v977_v25  ;;  %v746_v58 = vunpack.i.l.bf16 %v977_v25 }
 0x1f1   :  { %v757_v37 = vunpack.i.h.bf16 %v755_v29  ;;  %v756_v38 = vunpack.i.l.bf16 %v755_v29 }
 0x1f2   :  { %v150_v51 = vsel %vm147_vm9, %v726_v36, %v727_v34  ;;  %v102_v22 = vsel %vm99_vm8, %v746_v58, %v747_v57 }
 0x1f3   :  { %v148_v49 = vsel %vm147_vm9, %v756_v38, %v757_v37  ;;  %v149_v50 = vsel %vm147_vm9, %v757_v37, %v726_v36  ;;  %v156_v54 = vsel %vm147_vm9, %v727_v34, %v756_v38  ;;  %v269_v7 = vsel %vm24_vm0, %v150_v51, %v244_v44 }
 0x1f4   :  { %v267_v5 = vsel %vm24_vm0, %v148_v49, %v242_v39  ;;  %v268_v6 = vsel %vm24_vm0, %v149_v50, %v243_v43  ;;  %v270_v8 = vsel %vm24_vm0, %v156_v54, %v245_v45  ;;  %v226_v29 = vrot.slane %v102_v22, 4 }
 0x1f6   :  { %v261_v34 = vsel %vm24_vm0, %v943_v47, %v226_v29  ;;  %v365_v29 = vperm.slane %v911_v3, 4 }
 0x1f7   :  { %v735_v59 = vpop.permute.xlu1 %734  ;;  %v760_v60 = vpop.permute.xlu0 %759 }
 0x1f8   :  { %v737_v61 = vunpack.i.h.bf16 %v735_v59  ;;  %v736_v62 = vunpack.i.l.bf16 %v735_v59  ;;  %v762_v63 = vunpack.i.h.bf16 %v760_v60  ;;  %v761_v4 = vunpack.i.l.bf16 %v760_v60  ;;  %v770_v21 = vpop.permute.xlu2 %769 }
 0x1f9   :  { %v772_v24 = vunpack.i.h.bf16 %v770_v21  ;;  %v771_v25 = vunpack.i.l.bf16 %v770_v21 }
 0x1fa   :  { %v181_v9 = vsel %vm180_vm10, %v761_v4, %v762_v63  ;;  %v182_v10 = vsel %vm180_vm10, %v762_v63, %v736_v62  ;;  %v183_v11 = vsel %vm180_vm10, %v736_v62, %v737_v61  ;;  %v189_v12 = vsel %vm180_vm10, %v737_v61, %v761_v4 }
 0x1fb   :  { %v271_v13 = vsel %vm24_vm0, %v181_v9, %v251_v55  ;;  %v272_v14 = vsel %vm24_vm0, %v182_v10, %v252_v46  ;;  %v273_v15 = vsel %vm24_vm0, %v183_v11, %v253_v40  ;;  %v274_v16 = vsel %vm24_vm0, %v189_v12, %v254_v56 }
 0x1fc   :  { %v280_v17 = vpack.c.bf16 %v271_v13, %v267_v5  ;;  %v281_v18 = vpack.c.bf16 %v272_v14, %v268_v6  ;;  %v282_v19 = vpack.c.bf16 %v273_v15, %v269_v7  ;;  %v283_v20 = vpack.c.bf16 %v274_v16, %v270_v8 }
 0x1fd   :  { %v117_v32 = vsel %vm114_vm12, %v771_v25, %v772_v24  ;;  %v275_v40 = vpack.c.bf16 %v19_v33, %v19_v33  ;;  %v362_v15 = vperm.slane %v896_v0, 4 }
 0x1fe   :  { %316 = vmatpush.bf16.msra.mxu0 %v280_v17  ;;  %329 = vmatpush.bf16.msra.mxu1 %v281_v18 }
 0x1ff   :  { %342 = vmatpush.bf16.msra.mxu2 %v282_v19  ;;  %355 = vmatpush.bf16.msra.mxu3 %v283_v20  ;;  %v750_v23 = vpop.permute.xlu1 %749  ;;  %v775_v38 = vpop.permute.xlu0 %774  ;;  %v364_v19 = vperm.slane %v906_v2, 4 }
 0x200   :  { %v752_v26 = vunpack.i.h.bf16 %v750_v23  ;;  %v751_v27 = vunpack.i.l.bf16 %v750_v23  ;;  %v777_v43 = vunpack.i.h.bf16 %v775_v38  ;;  %v776_v44 = vunpack.i.l.bf16 %v775_v38 }
 0x202   :  { %v135_v30 = vsel %vm132_vm11, %v751_v27, %v752_v26  ;;  %v134_v50 = vsel %vm132_vm11, %v777_v43, %v751_v27  ;;  %v133_v51 = vsel %vm132_vm11, %v776_v44, %v777_v43  ;;  %v138_v54 = vsel %vm132_vm11, %v752_v26, %v776_v44 }
 0x203   :  { %v235_v31 = vrot.slane %v135_v30, 4  ;;  %v234_v62 = vrot.slane %v134_v50, 4  ;;  %v233_v63 = vrot.slane %v133_v51, 4  ;;  %v236_v4 = vrot.slane %v138_v54, 4 }
 0x205   :  { %v265_v36 = vsel %vm24_vm0, %v117_v32, %v235_v31 }
 0x206   :  { %v278_v37 = vpack.c.bf16 %v265_v36, %v261_v34 }
 0x207   :  { %v765_v39 = vpop.permute.xlu1 %764 }
 0x208   :  { %v767_v41 = vunpack.i.h.bf16 %v765_v39  ;;  %v766_v42 = vunpack.i.l.bf16 %v765_v39  ;;  %343 = vmatpush.bf16.msra.mxu2 %v278_v37 }
 0x20a   :  { %v100_v45 = vsel %vm99_vm8, %v766_v42, %v767_v41  ;;  %v101_v46 = vsel %vm99_vm8, %v767_v41, %v746_v58  ;;  %v105_v47 = vsel %vm99_vm8, %v747_v57, %v766_v42  ;;  %v870_v42 = vmov 3  }
 0x20b   :  { %680 = vmatmul.msk.bf16.vlgmr.msra.gmra.mxu2 %vm293_vm13, %v275_v40  ;;  %v224_v49 = vrot.slane %v100_v45, 4  ;;  %v225_v55 = vrot.slane %v101_v46, 4  ;;  %v227_v56 = vrot.slane %v105_v47, 4  ;;  %784 = vset.pattern.permute.xlu2 %v870_v42 }
 0x20d   :  { %v259_v58 = vsel %vm24_vm0, %v954_v52, %v224_v49  ;;  %v260_v6 = vsel %vm24_vm0, %v956_v53, %v225_v55  ;;  %v262_v10 = vsel %vm24_vm0, %v945_v48, %v227_v56  ;;  %v363_v48 = vperm.slane %v901_v1, 4 }
 0x20f   :  { %v780_v59 = vpop.permute.xlu1 %779 }
 0x210   :  { %v782_v60 = vunpack.i.h.bf16 %v780_v59  ;;  %v781_v61 = vunpack.i.l.bf16 %v780_v59 }
 0x212   :  { %v115_v57 = vsel %vm114_vm12, %v781_v61, %v782_v60  ;;  %v116_v5 = vsel %vm114_vm12, %v782_v60, %v771_v25  ;;  %v123_v7 = vsel %vm114_vm12, %v772_v24, %v781_v61 }
 0x213   :  { %v263_v8 = vsel %vm24_vm0, %v115_v57, %v233_v63  ;;  %v264_v9 = vsel %vm24_vm0, %v116_v5, %v234_v62  ;;  %v266_v11 = vsel %vm24_vm0, %v123_v7, %v236_v4  ;;  %v871_v62 = vmov 4  }
 0x214   :  { %v276_v12 = vpack.c.bf16 %v263_v8, %v259_v58  ;;  %v277_v52 = vpack.c.bf16 %v264_v9, %v260_v6  ;;  %v279_v13 = vpack.c.bf16 %v266_v11, %v262_v10 }
 0x216   :  { %317 = vmatpush.bf16.msra.mxu0 %v276_v12  ;;  %330 = vmatpush.bf16.msra.mxu1 %v277_v52 }
 0x217   :  { %356 = vmatpush.bf16.msra.mxu3 %v279_v13 }
 0x219   :  { %678 = vmatmul.msk.bf16.vlgmr.msra.gmra.mxu0 %vm293_vm13, %v275_v40  ;;  %679 = vmatmul.msk.bf16.vlgmr.msra.gmra.mxu1 %vm293_vm13, %v275_v40 }
 0x21a   :  { %681 = vmatmul.msk.bf16.vlgmr.msra.gmra.mxu3 %vm293_vm13, %v275_v40 }
 0x249   :  { %v291_v14 = vpop.permute.xlu2 %290 }
 0x28e   :  { %v345_v53 = vpop.f32.mrf.mxu2 }
 0x28f   :  { %v346_v16 = vadd.f32 %v345_v53, %v291_v14 }
 0x291   :  { %v368_v25 = vmul.f32 %v364_v19, %v346_v16 }
 0x293   :  { %v378_v32 = vmul.f32 %v368_v25, %v368_v25 }
 0x296   :  { %v319_v17 = vpop.f32.mrf.mxu0  ;;  %v332_v18 = vpop.f32.mrf.mxu1 }
 0x297   :  { %v320_v20 = vadd.f32 %v319_v17, %v291_v14  ;;  %v333_v21 = vadd.f32 %v332_v18, %v291_v14  ;;  %v347_v22 = vpop.f32.mrf.mxu2 }
 0x299   :  { %v366_v23 = vmul.f32 %v362_v15, %v320_v20  ;;  %v367_v24 = vmul.f32 %v363_v48, %v333_v21 }
 0x29b   :  { %v376_v26 = vmul.f32 %v366_v23, %v366_v23  ;;  %v377_v27 = vmul.f32 %v367_v24, %v367_v24  ;;  %v370_v28 = vadd.f32 %v367_v24, %v366_v23 }
 0x29d   :  { %v358_v30 = vpop.f32.mrf.mxu3  ;;  %v380_v33 = vadd.f32 %v377_v27, %v376_v26  ;;  %v371_v36 = vadd.f32 %v370_v28, %v368_v25 }
 0x29e   :  { %v359_v0 = vadd.f32 %v358_v30, %v291_v14  ;;  %v321_v31 = vpop.f32.mrf.mxu0  ;;  %v334_v1 = vpop.f32.mrf.mxu1 }
 0x29f   :  { %v381_v38 = vadd.f32 %v380_v33, %v378_v32 }
 0x2a0   :  { %v369_v34 = vmul.f32 %v365_v29, %v359_v0 }
 0x2a2   :  { %v372_v2 = vadd.f32 %v371_v36, %v369_v34  ;;  %v379_v37 = vmul.f32 %v369_v34, %v369_v34 }
 0x2a4   :  { %373 = vadd.xlane.f32.xlu0 %v372_v2  ;;  %v382_v39 = vadd.f32 %v381_v38, %v379_v37 }
 0x2a5   :  { %v360_v40 = vpop.f32.mrf.mxu3 }
 0x2a6   :  { %383 = vadd.xlane.f32.xlu1 %v382_v39 }
 0x317   :  { %v374_v41 = vpop.xlane.xlu0 %373 }
 0x318   :  { %v375_v43 = vmul.f32 0.0025510204, %v374_v41 }
 0x319   :  { %v384_v3 = vpop.xlane.xlu1 %383 }
 0x31a   :  { %v386_v44 = vmul.f32 %v375_v43, %v375_v43  ;;  %v385_v45 = vmul.f32 0.0025510204, %v384_v3 }
 0x31c   :  { %v387_v46 = vsub.f32 %v385_v45, %v386_v44 }
 0x31e   :  { %v388_v47 = vadd.f32 1e-05, %v387_v46 }
 0x320   :  { %856 = vrsqrt.f32 %v388_v47  ;;  %vm395_vm15 = vweird.f32 %v388_v47 }
 0x326   :  { %v857_v49 = vpop.eup %856 }
 0x327   :  { %v390_v50 = vmul.f32 %v857_v49, %v388_v47  ;;  %vm396_vm14 = vweird.f32 %v857_v49 }
 0x328   :  { %vm397_vm1 = vmor %vm395_vm15, %vm396_vm14 }
 0x329   :  { %v391_v51 = vmul.f32 %v857_v49, %v390_v50 }
 0x32b   :  { %v392_v54 = vmul.f32 0.5, %v391_v51 }
 0x32d   :  { %v393_v55 = vsub.f32 1.5, %v392_v54 }
 0x32f   :  { %v394_v56 = vmul.f32 %v857_v49, %v393_v55 }
 0x331   :  { %v398_v59 = vsel %vm397_vm1, %v857_v49, %v394_v56 }
 0x332   :  { %v399_v60 = vmul.f32 %v398_v59, %v936_v35 }
 0x334   :  { %v400_v61 = vmul.f32 %v399_v60, %v375_v43 }
 0x336   :  { %402 = vrot.lane.b32.xlu2 %v400_v61, %s859_s21 }
 0x33e   :  { %408 = vperm.xlu2 %784, %v399_v60  }
 0x346   :  { %785 = vset.pattern.permute.xlu2 %v871_v62 }
 0x390   :  { %v403_v63 = vpop.permute.xlu2 %402 }
 0x391   :  { %v405_v4 = vsub.f32 %v936_v35, %v403_v63 }
 0x393   :  { %417 = vperm.xlu2 %785, %v405_v4  }
 0x398   :  { %v409_v58 = vpop.permute.xlu2 %408 }
 0x399   :  { %v411_v57 = vmul.f32 %v409_v58, %v320_v20  ;;  %v413_v5 = vmul.f32 %v409_v58, %v346_v16  ;;  %v412_v10 = vmul.f32 %v409_v58, %v333_v21  ;;  %v414_v11 = vmul.f32 %v409_v58, %v359_v0 }
 0x3ed   :  { %v418_v6 = vpop.permute.xlu2 %417 }
 0x3ee   :  { %v1044_v7 = vadd.f32 %v418_v6, %v411_v57  ;;  %v1046_v8 = vadd.f32 %v418_v6, %v413_v5  ;;  %v1053_v12 = vadd.f32 %v418_v6, %v412_v10  ;;  %v1055_v52 = vadd.f32 %v418_v6, %v414_v11 }
 0x3f0   :  { %v806_v9 = vpack.i.bf16 %v1046_v8, %v1044_v7  ;;  %v821_v13 = vpack.i.bf16 %v1053_v12, %v1055_v52 }
 0x3f2   :  { %807 = vrot.lane.b32.xlu1 %v806_v9, %s861_s22  ;;  %797 = vrot.lane.b32.xlu0 %v806_v9, %s866_s27 }
 0x3f3   :  { %787 = vrot.lane.b32.xlu2 %v806_v9, %s863_s24 }
 0x3fa   :  { %837 = vrot.lane.b32.xlu1 %v806_v9, %s868_s29  ;;  %822 = vrot.lane.b32.xlu0 %v821_v13, %s864_s25 }
 0x3fb   :  { %792 = vrot.lane.b32.xlu2 %v821_v13, %s863_s24 }
 0x402   :  { %468 = vrot.lane.b32.xlu1 %v1055_v52, %s867_s28  ;;  %832 = vrot.lane.b32.xlu0 %v821_v13, %s862_s23 }
 0x403   :  { %802 = vrot.lane.b32.xlu2 %v821_v13, %s866_s27 }
 0x40a   :  { %447 = vrot.lane.b32.xlu1 %v1053_v12, %s868_s29  ;;  %842 = vrot.lane.b32.xlu0 %v806_v9, %s867_s28 }
 0x40b   :  { %812 = vrot.lane.b32.xlu2 %v821_v13, %s861_s22 }
 0x412   :  { %434 = vrot.lane.b32.xlu0 %v1055_v52, %s865_s26 }
 0x413   :  { %817 = vrot.lane.b32.xlu2 %v806_v9, %s864_s25 }
 0x41a   :  { %430 = vrot.lane.b32.xlu0 %v1053_v12, %s865_s26 }
 0x41b   :  { %827 = vrot.lane.b32.xlu2 %v806_v9, %s862_s23 }
 0x423   :  { %451 = vrot.lane.b32.xlu2 %v1055_v52, %s868_s29 }
 0x42b   :  { %847 = vrot.lane.b32.xlu2 %v806_v9, %s865_s26 }
 0x433   :  { %464 = vrot.lane.b32.xlu2 %v1053_v12, %s867_s28 }
 0x44d   :  { %v788_v53 = vpop.permute.xlu2 %787 }
 0x44e   :  { %v790_v15 = vunpack.i.h.bf16 %v788_v53  ;;  %v789_v48 = vunpack.i.l.bf16 %v788_v53 }
 0x455   :  { %v793_v14 = vpop.permute.xlu2 %792 }
 0x456   :  { %v795_v16 = vunpack.i.h.bf16 %v793_v14  ;;  %v794_v17 = vunpack.i.l.bf16 %v793_v14 }
 0x458   :  { %v555_v18 = vsel %vm213_vm4, %v789_v48, %v795_v16  ;;  %v556_v19 = vsel %vm213_vm4, %v795_v16, %v790_v15  ;;  %v557_v20 = vsel %vm213_vm4, %v790_v15, %v794_v17  ;;  %v563_v21 = vsel %vm213_vm4, %v794_v17, %v789_v48 }
 0x459   :  { %v581_v22 = vpack.c.bf16 %v555_v18, %v555_v18  ;;  %v582_v23 = vpack.c.bf16 %v556_v19, %v556_v19  ;;  %v583_v24 = vpack.c.bf16 %v557_v20, %v557_v20  ;;  %v584_v25 = vpack.c.bf16 %v563_v21, %v563_v21  ;;  %v23_v20 = vld [vmem:[%s1164_s2 + $0x8] sm:$0xff] }
 0x45b   :  { %v599_v26 = vsel %vm24_vm0, %v581_v22, 0  ;;  %v602_v27 = vsel %vm24_vm0, %v582_v23, 0  ;;  %v605_v28 = vsel %vm24_vm0, %v583_v24, 0  ;;  %v608_v29 = vsel %vm24_vm0, %v584_v25, 0 }
 0x45c   :  { %613 = vmatpush.bf16.msrb.mxu0 %v599_v26  ;;  %627 = vmatpush.bf16.msrb.mxu1 %v602_v27  ;;  %v872_v27 = vmov 5   ;;  %vm594_vm0 = vcmask 588800  }
 0x45d   :  { %641 = vmatpush.bf16.msrb.mxu2 %v605_v28  ;;  %655 = vmatpush.bf16.msrb.mxu3 %v608_v29  ;;  %v803_v30 = vpop.permute.xlu2 %802 }
 0x45e   :  { %v805_v0 = vunpack.i.h.bf16 %v803_v30  ;;  %v804_v31 = vunpack.i.l.bf16 %v803_v30  ;;  %851 = vset.pattern.permute.xlu1 %v872_v27  ;;  %852 = vset.pattern.permute.xlu2 %v872_v27 }
 0x45f   :  { %586 = vperm.xlu1 %851, %v936_v35   ;;  %591 = vperm.xlu2 %852, %v23_v20   ;;  %v20_v35 = vld [vmem:[%s1165_s1 + $0x8] sm:$0xff] }
 0x460   :  { %853 = vset.pattern.permute.xlu0 %v872_v27 }
 0x464   :  { %v808_v1 = vpop.permute.xlu1 %807  ;;  %v798_v32 = vpop.permute.xlu0 %797 }
 0x465   :  { %v810_v33 = vunpack.i.h.bf16 %v808_v1  ;;  %v809_v34 = vunpack.i.l.bf16 %v808_v1  ;;  %v800_v36 = vunpack.i.h.bf16 %v798_v32  ;;  %v799_v2 = vunpack.i.l.bf16 %v798_v32  ;;  %v813_v37 = vpop.permute.xlu2 %812 }
 0x466   :  { %v815_v38 = vunpack.i.h.bf16 %v813_v37  ;;  %v814_v39 = vunpack.i.l.bf16 %v813_v37  ;;  %v21_v37 = vld [vmem:[%s1165_s1 + $0x10] sm:$0xff] }
 0x467   :  { %v521_v40 = vsel %vm180_vm10, %v799_v2, %v805_v0  ;;  %v522_v41 = vsel %vm180_vm10, %v805_v0, %v800_v36  ;;  %v523_v42 = vsel %vm180_vm10, %v800_v36, %v804_v31  ;;  %v529_v43 = vsel %vm180_vm10, %v804_v31, %v799_v2 }
 0x468   :  { %v538_v3 = vsel %vm198_vm7, %v809_v34, %v815_v38  ;;  %v539_v44 = vsel %vm198_vm7, %v815_v38, %v810_v33  ;;  %v540_v45 = vsel %vm198_vm7, %v810_v33, %v814_v39  ;;  %v546_v46 = vsel %vm198_vm7, %v814_v39, %v809_v34 }
 0x469   :  { %v577_v47 = vpack.c.bf16 %v538_v3, %v521_v40  ;;  %v578_v49 = vpack.c.bf16 %v539_v44, %v522_v41  ;;  %v579_v50 = vpack.c.bf16 %v540_v45, %v523_v42  ;;  %v580_v51 = vpack.c.bf16 %v546_v46, %v529_v43 }
 0x46a   :  { %v564_v43 = vpack.c.bf16 %v21_v37, %v20_v35 }
 0x46b   :  { %614 = vmatpush.bf16.msrb.mxu0 %v577_v47  ;;  %628 = vmatpush.bf16.msrb.mxu1 %v578_v49 }
 0x46c   :  { %642 = vmatpush.bf16.msrb.mxu2 %v579_v50  ;;  %656 = vmatpush.bf16.msrb.mxu3 %v580_v51  ;;  %v823_v54 = vpop.permute.xlu0 %822  ;;  %v1097_v62 = vpop.permute.xlu1 %837 }
 0x46d   :  { %v818_v55 = vpop.permute.xlu2 %817  ;;  %v825_v56 = vunpack.i.h.bf16 %v823_v54  ;;  %v824_v59 = vunpack.i.l.bf16 %v823_v54  ;;  %v840_v22 = vunpack.i.h.bf16 %v1097_v62  ;;  %v839_v23 = vunpack.i.l.bf16 %v1097_v62 }
 0x46e   :  { %v820_v60 = vunpack.i.h.bf16 %v818_v55  ;;  %v819_v61 = vunpack.i.l.bf16 %v818_v55 }
 0x470   :  { %v487_v9 = vsel %vm147_vm9, %v819_v61, %v825_v56  ;;  %v488_v10 = vsel %vm147_vm9, %v825_v56, %v820_v60  ;;  %v489_v11 = vsel %vm147_vm9, %v820_v60, %v824_v59  ;;  %v495_v13 = vsel %vm147_vm9, %v824_v59, %v819_v61 }
 0x474   :  { %v833_v63 = vpop.permute.xlu0 %832  ;;  %v469_v28 = vpop.permute.xlu1 %468 }
 0x475   :  { %v835_v4 = vunpack.i.h.bf16 %v833_v63  ;;  %v834_v58 = vunpack.i.l.bf16 %v833_v63  ;;  %v828_v57 = vpop.permute.xlu2 %827 }
 0x476   :  { %v830_v5 = vunpack.i.h.bf16 %v828_v57  ;;  %v829_v6 = vunpack.i.l.bf16 %v828_v57 }
 0x478   :  { %v504_v53 = vsel %vm165_vm6, %v829_v6, %v835_v4  ;;  %v505_v14 = vsel %vm165_vm6, %v835_v4, %v830_v5  ;;  %v506_v15 = vsel %vm165_vm6, %v830_v5, %v834_v58  ;;  %v512_v48 = vsel %vm165_vm6, %v834_v58, %v829_v6 }
 0x479   :  { %v573_v16 = vpack.c.bf16 %v504_v53, %v487_v9  ;;  %v574_v17 = vpack.c.bf16 %v505_v14, %v488_v10  ;;  %v575_v18 = vpack.c.bf16 %v506_v15, %v489_v11  ;;  %v576_v19 = vpack.c.bf16 %v512_v48, %v495_v13 }
 0x47b   :  { %615 = vmatpush.bf16.msrb.mxu0 %v573_v16  ;;  %629 = vmatpush.bf16.msrb.mxu1 %v574_v17 }
 0x47c   :  { %643 = vmatpush.bf16.msrb.mxu2 %v575_v18  ;;  %657 = vmatpush.bf16.msrb.mxu3 %v576_v19  ;;  %v843_v21 = vpop.permute.xlu0 %842  ;;  %v448_v42 = vpop.permute.xlu1 %447 }
 0x47d   :  { %v845_v24 = vunpack.i.h.bf16 %v843_v21  ;;  %v844_v25 = vunpack.i.l.bf16 %v843_v21  ;;  %v452_v26 = vpop.permute.xlu2 %451  ;;  %v453_v3 = vsel %vm114_vm12, %v839_v23, %v448_v42  ;;  %v454_v46 = vsel %vm114_vm12, %v448_v42, %v840_v22 }
 0x47e   :  { %v455_v29 = vsel %vm114_vm12, %v840_v22, %v452_v26  ;;  %v461_v30 = vsel %vm114_vm12, %v452_v26, %v839_v23 }
 0x47f   :  { %v472_v0 = vsel %vm132_vm11, %v845_v24, %v469_v28  ;;  %v478_v31 = vsel %vm132_vm11, %v469_v28, %v844_v25 }
 0x480   :  { %v571_v1 = vpack.c.bf16 %v472_v0, %v455_v29  ;;  %v572_v32 = vpack.c.bf16 %v478_v31, %v461_v30 }
 0x482   :  { %644 = vmatpush.bf16.msrb.mxu2 %v571_v1  ;;  %658 = vmatpush.bf16.msrb.mxu3 %v572_v32 }
 0x484   :  { %v435_v33 = vpop.permute.xlu0 %434 }
 0x485   :  { %v848_v34 = vpop.permute.xlu2 %847 }
 0x486   :  { %v850_v36 = vunpack.i.h.bf16 %v848_v34  ;;  %v849_v2 = vunpack.i.l.bf16 %v848_v34 }
 0x488   :  { %v438_v38 = vsel %vm99_vm8, %v850_v36, %v435_v33  ;;  %v444_v39 = vsel %vm99_vm8, %v435_v33, %v849_v2 }
 0x489   :  { %v567_v40 = vpack.c.bf16 %v438_v38, %v1046_v8  ;;  %v568_v41 = vpack.c.bf16 %v444_v39, %v1055_v52 }
 0x48b   :  { %645 = vmatpush.bf16.msrb.mxu2 %v567_v40  ;;  %659 = vmatpush.bf16.msrb.mxu3 %v568_v41 }
 0x48c   :  { %v431_v44 = vpop.permute.xlu0 %430 }
 0x48d   :  { %v465_v45 = vpop.permute.xlu2 %464  ;;  %v436_v50 = vsel %vm99_vm8, %v849_v2, %v431_v44  ;;  %v437_v51 = vsel %vm99_vm8, %v431_v44, %v850_v36 }
 0x48e   :  { %v470_v47 = vsel %vm132_vm11, %v844_v25, %v465_v45  ;;  %v471_v49 = vsel %vm132_vm11, %v465_v45, %v845_v24  ;;  %684 = vmatmul.msk.bf16.vlgmr.msrb.gmra.mxu2 %vm594_vm0, %v564_v43  ;;  %685 = vmatmul.msk.bf16.vlgmr.msrb.gmra.mxu3 %vm594_vm0, %v564_v43  ;;  %v565_v54 = vpack.c.bf16 %v436_v50, %v1044_v7 }
 0x48f   :  { %v569_v8 = vpack.c.bf16 %v470_v47, %v453_v3  ;;  %v570_v52 = vpack.c.bf16 %v471_v49, %v454_v46  ;;  %v566_v55 = vpack.c.bf16 %v437_v51, %v1053_v12 }
 0x491   :  { %616 = vmatpush.bf16.msrb.mxu0 %v569_v8  ;;  %630 = vmatpush.bf16.msrb.mxu1 %v570_v52 }
 0x495   :  { %617 = vmatpush.bf16.msrb.mxu0 %v565_v54  ;;  %631 = vmatpush.bf16.msrb.mxu1 %v566_v55 }
 0x498   :  { %682 = vmatmul.msk.bf16.vlgmr.msrb.gmra.mxu0 %vm594_vm0, %v564_v43  ;;  %683 = vmatmul.msk.bf16.vlgmr.msrb.gmra.mxu1 %vm594_vm0, %v564_v43 }
 0x4b9   :  { %v592_v58 = vpop.permute.xlu2 %591 }
 0x4d1   :  { %v587_v56 = vpop.permute.xlu1 %586 }
 0x511   :  { %v647_v59 = vpop.f32.mrf.mxu2  ;;  %v661_v60 = vpop.f32.mrf.mxu3 }
 0x512   :  { %v648_v61 = vadd.f32 %v647_v59, %v587_v56  ;;  %v662_v62 = vadd.f32 %v661_v60, %v587_v56 }
 0x514   :  { %668 = vst [vmem:[%s1166_s3 + $0x10] sm:$0xff] %v648_v61 }
 0x515   :  { %669 = vst [vmem:[%s1166_s3 + $0x18] sm:$0xff] %v662_v62  ;;  %v619_v7 = vpop.f32.mrf.mxu0  ;;  %v633_v12 = vpop.f32.mrf.mxu1 }
 0x516   :  { %v620_v63 = vadd.f32 %v619_v7, %v587_v56  ;;  %v634_v4 = vadd.f32 %v633_v12, %v587_v56 }
 0x518   :  { %666 = vst [vmem:[%s1166_s3] sm:$0xff] %v620_v63 }
 0x519   :  { %667 = vst [vmem:[%s1166_s3 + $0x8] sm:$0xff] %v634_v4  ;;  %v649_v57 = vpop.f32.mrf.mxu2  ;;  %v663_v5 = vpop.f32.mrf.mxu3 }
 0x51a   :  { %v650_v6 = vadd.f32 %v649_v57, %v592_v58  ;;  %v664_v9 = vadd.f32 %v663_v5, %v592_v58 }
 0x51c   :  { %672 = vst [vmem:[%s1166_s3 + $0x30] sm:$0xff] %v650_v6 }
 0x51d   :  { %673 = vst [vmem:[%s1166_s3 + $0x38] sm:$0xff] %v664_v9  ;;  %v621_v10 = vpop.f32.mrf.mxu0  ;;  %v635_v11 = vpop.f32.mrf.mxu1 }
 0x51e   :  { %v622_v13 = vadd.f32 %v621_v10, %v592_v58  ;;  %v636_v53 = vadd.f32 %v635_v11, %v592_v58 }
 0x520   :  { %670 = vst [vmem:[%s1166_s3 + $0x20] sm:$0xff] %v622_v13 }
 0x521   :  { %671 = vst [vmem:[%s1166_s3 + $0x28] sm:$0xff] %v636_v53 }

</bundles_post_ra>
